<compile_context>
chip_gen: v6e
topology: v6e:2x2x1
jax: 0.10.0
libtpu: 0.0.40
codegen_flags: <defaults>
</compile_context>

<pallas_src>
import functools

import jax
import jax.numpy as jnp
from jax import lax
from jax.experimental import pallas as pl
from jax.experimental.pallas import tpu as pltpu


# ---------------------------------------------------------------------------
# Kernel 1: additive attention, one grid step per batch row (batch-parallel).
# ---------------------------------------------------------------------------
def attention_kernel(enc_ref, h_ref, wa_e_ref, wa_h_ref, ba_ref, v_ref,
                     attn_ref, ctx_ref):
    enc = enc_ref[0]                                   # (T, H)
    h = h_ref[0]                                       # (1, H)

    # energy = tanh([h; enc] @ Wa^T + b) with Wa^T split so the enc-side
    # projection is a single (T,H)x(H,H) MXU matmul.
    e_enc = jnp.dot(enc, wa_e_ref[...], preferred_element_type=jnp.float32)   # (T, H)
    e_h = jnp.dot(h, wa_h_ref[...], preferred_element_type=jnp.float32) + ba_ref[...]  # (1, H)
    energy = jnp.tanh(e_enc + e_h)                     # (T, H)

    # score[0, t] = v . energy[t, :]  (contract lane dims of both -> (1, T))
    score = lax.dot_general(v_ref[...], energy,
                            (((1,), (1,)), ((), ())),
                            preferred_element_type=jnp.float32)   # (1, T)

    # softmax over T (lane axis)
    m = jnp.max(score, axis=1, keepdims=True)
    p = jnp.exp(score - m)
    attn = p / jnp.sum(p, axis=1, keepdims=True)       # (1, T)

    # context = attn @ enc  -> (1, H)
    ctx = jnp.dot(attn, enc, preferred_element_type=jnp.float32)

    attn_ref[0] = attn
    ctx_ref[0] = ctx


# ---------------------------------------------------------------------------
# Kernel 2: GRU cell + output projection + log_softmax, full batch, fused.
# ---------------------------------------------------------------------------
def gru_out_kernel(emb_ref, ctx_ref, h_ref,
                   wie_ref, wic_ref, whh_ref, bih_ref, bhh_ref,
                   woh_ref, woc_ref, bo_ref,
                   logp_ref, hnew_ref, *, hidden_dim):
    H = hidden_dim
    emb = emb_ref[...]                                 # (B, E)
    ctx = ctx_ref[...]                                 # (B, H)
    h = h_ref[...]                                     # (B, H)

    # GRU gates (PyTorch order r, z, n); concat([emb, ctx]) folded into two dots.
    gi = (jnp.dot(emb, wie_ref[...], preferred_element_type=jnp.float32)
          + jnp.dot(ctx, wic_ref[...], preferred_element_type=jnp.float32)
          + bih_ref[...])                              # (B, 3H)
    gh = jnp.dot(h, whh_ref[...], preferred_element_type=jnp.float32) + bhh_ref[...]

    r = jax.nn.sigmoid(gi[:, :H] + gh[:, :H])
    z = jax.nn.sigmoid(gi[:, H:2 * H] + gh[:, H:2 * H])
    n = jnp.tanh(gi[:, 2 * H:] + r * gh[:, 2 * H:])
    h_new = (1.0 - z) * n + z * h                      # (B, H)

    # out(cat([gru_out, ctx])) folded into two dots, log_softmax fused in-kernel.
    logits = (jnp.dot(h_new, woh_ref[...], preferred_element_type=jnp.float32)
              + jnp.dot(ctx, woc_ref[...], preferred_element_type=jnp.float32)
              + bo_ref[...])                           # (B, V)
    m = jnp.max(logits, axis=1, keepdims=True)
    lse = m + jnp.log(jnp.sum(jnp.exp(logits - m), axis=1, keepdims=True))
    logp_ref[...] = logits - lse
    hnew_ref[...] = h_new


# ---------------------------------------------------------------------------
# Wrapper
# ---------------------------------------------------------------------------
def decoder_forward(input_ids, last_hidden, encoder_outputs, params, *, hidden_dim):
    H = hidden_dim
    T, B, _ = encoder_outputs.shape
    V = params["bo"].shape[1]

    # Glue: embedding gather.
    # TODO(synk): nn.Dropout(0.2) is treated as eval-mode identity (deterministic forward).
    emb = jnp.take(params["embed"], input_ids, axis=0)          # (B, E)
    h_prev = last_hidden[-1]                                    # (B, H)

    # Layout glue (matches torch's encoder_outputs.transpose(0,1)).
    enc_bth = jnp.transpose(encoder_outputs, (1, 0, 2))         # (B, T, H)
    h3 = h_prev[:, None, :]                                     # (B, 1, H)

    full2d = lambda b: (0, 0)
    attn_spec = pltpu.PrefetchScalarGridSpec(
        num_scalar_prefetch=0,
        grid=(B,),
        in_specs=[
            pl.BlockSpec((1, T, H), lambda b: (b, 0, 0)),       # encoder outputs row b
            pl.BlockSpec((1, 1, H), lambda b: (b, 0, 0)),       # hidden row b
            pl.BlockSpec((H, H), full2d),                       # Wa_enc^T (resident)
            pl.BlockSpec((H, H), full2d),                       # Wa_hid^T (resident)
            pl.BlockSpec((1, H), full2d),                       # b_attn
            pl.BlockSpec((1, H), full2d),                       # v
        ],
        out_specs=[
            pl.BlockSpec((1, 1, T), lambda b: (b, 0, 0)),       # attn weights
            pl.BlockSpec((1, 1, H), lambda b: (b, 0, 0)),       # context
        ],
    )
    attn_w, ctx3 = pl.pallas_call(
        attention_kernel,
        grid_spec=attn_spec,
        out_shape=(
            jax.ShapeDtypeStruct((B, 1, T), jnp.float32),
            jax.ShapeDtypeStruct((B, 1, H), jnp.float32),
        ),
        compiler_params=pltpu.CompilerParams(
            dimension_semantics=("parallel",)),                 # batch across cores (v7x)
    )(enc_bth, h3, params["wa_e"], params["wa_h"], params["ba"], params["v"])

    ctx = ctx3.reshape(B, H)                                    # free reshape

    kernel2 = functools.partial(gru_out_kernel, hidden_dim=H)
    logp, h_new = pl.pallas_call(
        kernel2,
        out_shape=(
            jax.ShapeDtypeStruct((B, V), jnp.float32),
            jax.ShapeDtypeStruct((B, H), jnp.float32),
        ),
    )(emb, ctx, h_prev,
      params["wie"], params["wic"], params["whh"], params["bih"], params["bhh"],
      params["wo_h"], params["wo_c"], params["bo"])

    hidden = h_new[None]                                        # (1, B, H)
    return logp, hidden, attn_w


# ---------------------------------------------------------------------------
# Pure-JAX reference mirroring the PyTorch Decoder forward (eval mode).
# ---------------------------------------------------------------------------
def _reference_forward(input_ids, last_hidden, encoder_outputs, params, *, hidden_dim):
    H = hidden_dim
    hp = lax.Precision.HIGHEST
    emb = jnp.take(params["embed"], input_ids, axis=0)          # (B, E)
    h = last_hidden[-1]                                         # (B, H)
    enc_bth = jnp.transpose(encoder_outputs, (1, 0, 2))         # (B, T, H)

    e_h = jnp.dot(h, params["wa_h"], precision=hp) + params["ba"]
    e_enc = jnp.einsum("bth,hk->btk", enc_bth, params["wa_e"], precision=hp)
    energy = jnp.tanh(e_enc + e_h[:, None, :])
    score = jnp.einsum("bth,h->bt", energy, params["v"][0], precision=hp)
    attn = jax.nn.softmax(score, axis=1)
    ctx = jnp.einsum("bt,bth->bh", attn, enc_bth, precision=hp)

    gi = (jnp.dot(emb, params["wie"], precision=hp)
          + jnp.dot(ctx, params["wic"], precision=hp) + params["bih"])
    gh = jnp.dot(h, params["whh"], precision=hp) + params["bhh"]
    r = jax.nn.sigmoid(gi[:, :H] + gh[:, :H])
    z = jax.nn.sigmoid(gi[:, H:2 * H] + gh[:, H:2 * H])
    n = jnp.tanh(gi[:, 2 * H:] + r * gh[:, 2 * H:])
    h_new = (1.0 - z) * n + z * h

    logits = (jnp.dot(h_new, params["wo_h"], precision=hp)
              + jnp.dot(ctx, params["wo_c"], precision=hp) + params["bo"])
    logp = jax.nn.log_softmax(logits, axis=1)
    return logp, h_new[None], attn[:, None, :]


def init_params(key, embed_dim, hidden_dim, output_dim):
    ks = jax.random.split(key, 13)
    kH = 1.0 / jnp.sqrt(hidden_dim)
    k2H = 1.0 / jnp.sqrt(2.0 * hidden_dim)
    u = lambda kk, shape, s: jax.random.uniform(kk, shape, jnp.float32, -s, s)
    return {
        "embed": jax.random.normal(ks[0], (output_dim, embed_dim), jnp.float32),
        # attention Linear(2H -> H): W^T split into hidden part / encoder part
        "wa_h": u(ks[1], (hidden_dim, hidden_dim), k2H),
        "wa_e": u(ks[2], (hidden_dim, hidden_dim), k2H),
        "ba":   u(ks[3], (1, hidden_dim), k2H),
        "v":    u(ks[4], (1, hidden_dim), kH),
        # GRU(H+E -> H): W_ih^T split into embedded part / context part, plus W_hh^T
        "wie":  u(ks[5], (embed_dim, 3 * hidden_dim), kH),
        "wic":  u(ks[6], (hidden_dim, 3 * hidden_dim), kH),
        "whh":  u(ks[7], (hidden_dim, 3 * hidden_dim), kH),
        "bih":  u(ks[8], (1, 3 * hidden_dim), kH),
        "bhh":  u(ks[9], (1, 3 * hidden_dim), kH),
        # out Linear(2H -> V): W^T split into GRU-output part / context part
        "wo_h": u(ks[10], (hidden_dim, output_dim), k2H),
        "wo_c": u(ks[11], (hidden_dim, output_dim), k2H),
        "bo":   u(ks[12], (1, output_dim), k2H),
    }


if __name__ == "__main__":
    embed_dim, hidden_dim, output_dim = 16, 32, 20
    seq_len, batch = 8, 2

    key = jax.random.PRNGKey(0)
    kp, ki, kh, ke = jax.random.split(key, 4)
    params = init_params(kp, embed_dim, hidden_dim, output_dim)
    input_ids = jax.random.randint(ki, (batch,), 0, output_dim, jnp.int32)
    last_hidden = jax.random.normal(kh, (1, batch, hidden_dim), jnp.float32)
    encoder_outputs = jax.random.normal(ke, (seq_len, batch, hidden_dim), jnp.float32)

    out, hidden, attn_w = decoder_forward(
        input_ids, last_hidden, encoder_outputs, params, hidden_dim=hidden_dim)
    out, hidden, attn_w = jax.block_until_ready((out, hidden, attn_w))

    ref_out, ref_hidden, ref_attn = _reference_forward(
        input_ids, last_hidden, encoder_outputs, params, hidden_dim=hidden_dim)

    assert out.shape == (batch, output_dim)
    assert hidden.shape == (1, batch, hidden_dim)
    assert attn_w.shape == (batch, 1, seq_len)
    assert jnp.allclose(out, ref_out, atol=1e-4, rtol=1e-4)
    assert jnp.allclose(hidden, ref_hidden, atol=1e-4, rtol=1e-4)
    assert jnp.allclose(attn_w, ref_attn, atol=1e-4, rtol=1e-4)

    print("KERNEL_OK")
</pallas_src>

<mosaic_0001>
module attributes {stable_mosaic.version = 11 : i64} {
  func.func @attention_kernel(%arg0: i32, %arg1: memref<1x8x32xf32, #tpu.memory_space<vmem>>, %arg2: memref<1x1x32xf32, #tpu.memory_space<vmem>>, %arg3: memref<32x32xf32, #tpu.memory_space<vmem>>, %arg4: memref<32x32xf32, #tpu.memory_space<vmem>>, %arg5: memref<1x32xf32, #tpu.memory_space<vmem>>, %arg6: memref<1x32xf32, #tpu.memory_space<vmem>>, %arg7: memref<1x1x8xf32, #tpu.memory_space<vmem>>, %arg8: memref<1x1x32xf32, #tpu.memory_space<vmem>>) attributes {dimension_semantics = [#tpu.dimension_semantics<parallel>], iteration_bounds = array<i64: 2>, scalar_prefetch = 0 : i64, scratch_operands = 0 : i64, tpu.core_type = #tpu.core_type<tc>, window_params = [{transform_indices = @transform_0, window_bounds = array<i64: 1, 8, 32>}, {transform_indices = @transform_1, window_bounds = array<i64: 1, 1, 32>}, {pipeline_mode = #tpu.pipeline_mode<synchronous>, transform_indices = @transform_2, window_bounds = array<i64: 32, 32>}, {pipeline_mode = #tpu.pipeline_mode<synchronous>, transform_indices = @transform_3, window_bounds = array<i64: 32, 32>}, {pipeline_mode = #tpu.pipeline_mode<synchronous>, transform_indices = @transform_4, window_bounds = array<i64: 1, 32>}, {pipeline_mode = #tpu.pipeline_mode<synchronous>, transform_indices = @transform_5, window_bounds = array<i64: 1, 32>}, {transform_indices = @transform_6, window_bounds = array<i64: 1, 1, 8>}, {transform_indices = @transform_7, window_bounds = array<i64: 1, 1, 32>}]} {
    %c0 = arith.constant 0 : index
    %c0_0 = arith.constant 0 : index
    %c0_1 = arith.constant 0 : index
    %0 = vector.load %arg1[%c0, %c0_0, %c0_1] : memref<1x8x32xf32, #tpu.memory_space<vmem>>, vector<1x8x32xf32>
    %1 = vector.shape_cast %0 : vector<1x8x32xf32> to vector<8x32xf32>
    %c0_2 = arith.constant 0 : index
    %c0_3 = arith.constant 0 : index
    %c0_4 = arith.constant 0 : index
    %2 = vector.load %arg2[%c0_2, %c0_3, %c0_4] : memref<1x1x32xf32, #tpu.memory_space<vmem>>, vector<1x1x32xf32>
    %3 = vector.shape_cast %2 : vector<1x1x32xf32> to vector<1x32xf32>
    %c0_5 = arith.constant 0 : index
    %c0_6 = arith.constant 0 : index
    %4 = vector.load %arg3[%c0_5, %c0_6] : memref<32x32xf32, #tpu.memory_space<vmem>>, vector<32x32xf32>
    %cst = arith.constant dense<0.000000e+00> : vector<8x32xf32>
    %5 = tpu.matmul %1, %4, %cst {dimension_numbers = #tpu.dot_dimension_numbers<[1], [0], [0], [1], [0, 0, 1, 1], [], []>} : vector<8x32xf32>, vector<32x32xf32>, vector<8x32xf32> -> vector<8x32xf32>
    %c0_7 = arith.constant 0 : index
    %c0_8 = arith.constant 0 : index
    %6 = vector.load %arg4[%c0_7, %c0_8] : memref<32x32xf32, #tpu.memory_space<vmem>>, vector<32x32xf32>
    %cst_9 = arith.constant dense<0.000000e+00> : vector<1x32xf32>
    %7 = tpu.matmul %3, %6, %cst_9 {dimension_numbers = #tpu.dot_dimension_numbers<[1], [0], [0], [1], [0, 0, 1, 1], [], []>} : vector<1x32xf32>, vector<32x32xf32>, vector<1x32xf32> -> vector<1x32xf32>
    %c0_10 = arith.constant 0 : index
    %c0_11 = arith.constant 0 : index
    %8 = vector.load %arg5[%c0_10, %c0_11] : memref<1x32xf32, #tpu.memory_space<vmem>>, vector<1x32xf32>
    %9 = arith.addf %7, %8 : vector<1x32xf32>
    %10 = vector.broadcast %9 : vector<1x32xf32> to vector<8x32xf32>
    %11 = arith.addf %5, %10 : vector<8x32xf32>
    %12 = math.tanh %11 : vector<8x32xf32>
    %c0_12 = arith.constant 0 : index
    %c0_13 = arith.constant 0 : index
    %13 = vector.load %arg6[%c0_12, %c0_13] : memref<1x32xf32, #tpu.memory_space<vmem>>, vector<1x32xf32>
    %cst_14 = arith.constant dense<0.000000e+00> : vector<1x8xf32>
    %14 = tpu.matmul %13, %12, %cst_14 {dimension_numbers = #tpu.dot_dimension_numbers<[1], [1], [0], [0], [0, 0, 1, 0], [], []>} : vector<1x32xf32>, vector<8x32xf32>, vector<1x8xf32> -> vector<1x8xf32>
    %cst_15 = arith.constant dense<0xFF800000> : vector<1xf32>
    %15 = vector.multi_reduction <maximumf>, %14, %cst_15 [1] : vector<1x8xf32> to vector<1xf32>
    %16 = vector.shape_cast %15 : vector<1xf32> to vector<1x1xf32>
    %17 = vector.broadcast %16 : vector<1x1xf32> to vector<1x8xf32>
    %18 = arith.subf %14, %17 : vector<1x8xf32>
    %19 = math.exp %18 : vector<1x8xf32>
    %cst_16 = arith.constant dense<0.000000e+00> : vector<1xf32>
    %20 = vector.multi_reduction <add>, %19, %cst_16 [1] : vector<1x8xf32> to vector<1xf32>
    %21 = vector.shape_cast %20 : vector<1xf32> to vector<1x1xf32>
    %22 = vector.broadcast %21 : vector<1x1xf32> to vector<1x8xf32>
    %23 = arith.divf %19, %22 : vector<1x8xf32>
    %cst_17 = arith.constant dense<0.000000e+00> : vector<1x32xf32>
    %24 = tpu.matmul %23, %1, %cst_17 {dimension_numbers = #tpu.dot_dimension_numbers<[1], [0], [0], [1], [0, 0, 1, 1], [], []>} : vector<1x8xf32>, vector<8x32xf32>, vector<1x32xf32> -> vector<1x32xf32>
    %c0_18 = arith.constant 0 : index
    %c0_19 = arith.constant 0 : index
    %c0_20 = arith.constant 0 : index
    %25 = vector.load %arg7[%c0_18, %c0_19, %c0_20] : memref<1x1x8xf32, #tpu.memory_space<vmem>>, vector<1x1x8xf32>
    %26 = vector.shape_cast %25 : vector<1x1x8xf32> to vector<1x8xf32>
    %27 = vector.shape_cast %23 : vector<1x8xf32> to vector<1x1x8xf32>
    tpu.vector_store %arg7[%c0_18, %c0_19, %c0_20], %27 {strides = array<i32>} : memref<1x1x8xf32, #tpu.memory_space<vmem>>, vector<1x1x8xf32>,
    %c0_21 = arith.constant 0 : index
    %c0_22 = arith.constant 0 : index
    %c0_23 = arith.constant 0 : index
    %28 = vector.load %arg8[%c0_21, %c0_22, %c0_23] : memref<1x1x32xf32, #tpu.memory_space<vmem>>, vector<1x1x32xf32>
    %29 = vector.shape_cast %28 : vector<1x1x32xf32> to vector<1x32xf32>
    %30 = vector.shape_cast %24 : vector<1x32xf32> to vector<1x1x32xf32>
    tpu.vector_store %arg8[%c0_21, %c0_22, %c0_23], %30 {strides = array<i32>} : memref<1x1x32xf32, #tpu.memory_space<vmem>>, vector<1x1x32xf32>,
    return
  }
  func.func @transform_0(%arg0: i32) -> (i32, i32, i32) {
    %c0_i32 = arith.constant 0 : i32
    %c0_i32_0 = arith.constant 0 : i32
    %c0_i32_1 = arith.constant 0 : i32
    return %arg0, %c0_i32, %c0_i32_0 : i32, i32, i32
  }
  func.func @transform_1(%arg0: i32) -> (i32, i32, i32) {
    %c0_i32 = arith.constant 0 : i32
    %c0_i32_0 = arith.constant 0 : i32
    %c0_i32_1 = arith.constant 0 : i32
    return %arg0, %c0_i32, %c0_i32_0 : i32, i32, i32
  }
  func.func @transform_2(%arg0: i32) -> (i32, i32) {
    %c0_i32 = arith.constant 0 : i32
    %c0_i32_0 = arith.constant 0 : i32
    %c0_i32_1 = arith.constant 0 : i32
    return %c0_i32, %c0_i32_0 : i32, i32
  }
  func.func @transform_3(%arg0: i32) -> (i32, i32) {
    %c0_i32 = arith.constant 0 : i32
    %c0_i32_0 = arith.constant 0 : i32
    %c0_i32_1 = arith.constant 0 : i32
    return %c0_i32, %c0_i32_0 : i32, i32
  }
  func.func @transform_4(%arg0: i32) -> (i32, i32) {
    %c0_i32 = arith.constant 0 : i32
    %c0_i32_0 = arith.constant 0 : i32
    %c0_i32_1 = arith.constant 0 : i32
    return %c0_i32, %c0_i32_0 : i32, i32
  }
  func.func @transform_5(%arg0: i32) -> (i32, i32) {
    %c0_i32 = arith.constant 0 : i32
    %c0_i32_0 = arith.constant 0 : i32
    %c0_i32_1 = arith.constant 0 : i32
    return %c0_i32, %c0_i32_0 : i32, i32
  }
  func.func @transform_6(%arg0: i32) -> (i32, i32, i32) {
    %c0_i32 = arith.constant 0 : i32
    %c0_i32_0 = arith.constant 0 : i32
    %c0_i32_1 = arith.constant 0 : i32
    return %arg0, %c0_i32, %c0_i32_0 : i32, i32, i32
  }
  func.func @transform_7(%arg0: i32) -> (i32, i32, i32) {
    %c0_i32 = arith.constant 0 : i32
    %c0_i32_0 = arith.constant 0 : i32
    %c0_i32_1 = arith.constant 0 : i32
    return %arg0, %c0_i32, %c0_i32_0 : i32, i32, i32
  }
}

</mosaic_0001>

<bundles_post_ra>
// kernel: tpu_custom_call.1
= control target key start
LH: loop header
LB: loop body
LE: loop exit
PB: predicated region body
PF: predicated region fallthrough
CT: control target
= control target key end

     0   :  { %s1547_s0 = inlined_call_operand.hbm [shape: f32[2,8,32], index: 0, kind: input, shape index: {}]   ;;  %s1548_s1 = inlined_call_operand.hbm [shape: f32[2,1,32], index: 1, kind: input, shape index: {}]   ;;  %s1549_s2 = inlined_call_operand.hbm [shape: f32[32,32], index: 2, kind: input, shape index: {}]   ;;  %s1550_s3 = inlined_call_operand.hbm [shape: f32[32,32], index: 3, kind: input, shape index: {}]   ;;  %s1551_s4 = inlined_call_operand.vmem [shape: f32[1,32], index: 4, kind: input, shape index: {}]   ;;  %s1552_s5 = inlined_call_operand.vmem [shape: f32[1,32], index: 5, kind: input, shape index: {}]   ;;  %s1553_s6 = inlined_call_operand.hbm [shape: f32[2,1,8], index: 6, kind: output, shape index: {0}]   ;;  %s1554_s7 = inlined_call_operand.hbm [shape: f32[2,1,32], index: 7, kind: output, shape index: {1}]  }
   0x1   :  { %1559 = sst [smem:[#allocation20_spill]] %s1547_s0 }
   0x2   :  { %1560 = sst [smem:[#allocation21_spill]] %s1549_s2 }
   0x3   :  { %1561 = sst [smem:[#allocation22_spill]] %s1550_s3 }
   0x4   :  { %13 = vsyncpa [#allocation3], 0 }
   0x5   :  { %15 = vsyncpa [#allocation3 + $0x1], 0 }
   0x6   :  { %16 = vsyncpa [#allocation6], 0 }
   0x7   :  { %18 = vsyncpa [#allocation6 + $0x1], 0 }
   0x8   :  { %19 = vsyncpa [#allocation9], 0 }
   0x9   :  { %20 = vsyncpa [#allocation4], 0 }
   0xa   :  { %22 = vsyncpa [#allocation4 + $0x1], 0 }
   0xb   :  { %23 = vsyncpa [#allocation12], 0 }
   0xc   :  { %25 = vsyncpa [#allocation12 + $0x1], 0  ;;  %s1278_s24 = smov 0   ;;  %s1280_s25 = smov 0  }
   0xd   :  { %s1282_s26 = smov 0   ;;  %s1284_s27 = smov 0  }
   0xe LB: > { %s1299_s28 = sadd.s32 4294967295, %s1226_s27   ;;  %s858_s29 = sadd.s32 4294967294, %s1226_s27   ;;  %s1226_s27 = sphi %s1284_s27, %s1587_s27   ;;  %s1222_s26 = sphi %s1282_s26, %s1586_s26   ;;  %s1218_s25 = sphi %s1280_s25, %s1585_s25   ;;  %s1214_s24 = sphi %s1278_s24, %s1584_s24  }
   0xf   : > { %p51_p0 = scmp.ne.s32.totalorder %s1218_s25, %s1214_s24  ;;  %p1555_p1 = scmp.eq.s32.totalorder %s1299_s28, 0 }
  0x10   : > { %p191_p3 = scmp.eq.s32.totalorder %s858_s29, 1  ;;  %p859_p5 = scmp.ge.s32.totalorder %s1226_s27, 1 }
  0x11   : > { %p1308_p4 = por %p1555_p1, %p51_p0  ;;  %p224_p7 = scmp.lt.s32.totalorder %s1226_s27, 3 }
  0x12   : > { %p1313_p6 = por %p191_p3, %p51_p0  ;;  %s1228_s10 = smov [#allocation7]  }
  0x13   : > { %s1562_s30 = scalar_select %p1308_p4, 1, 0 }
  0x14   : > { %s1563_s8 = scalar_select %p1313_p6, 1, 0 }
  0x15   : > { %p1318_p8 = pnand %p859_p5, %p224_p7  ;;  %s236_s11 = sshll.u32 %s1228_s10, 4  ;;  %s237_s11 = int_to_ptr.vmem [resolvable:$true] %s236_s11 }
  0x16   : > { %s1229_s13 = smov [#allocation8]   ;;  %s1023_s15 = scalar_lea.vmem %s237_s11, 512 }
  0x17   : > { %s1564_s9 = scalar_select %p1318_p8, 1, 0 }
  0x18   : > { %p941_p9 = pneg %p1318_p8  ;;  %s249_s14 = sshll.u32 %s1229_s13, 4  ;;  %s250_s14 = int_to_ptr.vmem [resolvable:$true] %s249_s14 }
  0x19   : > { %p1024_p13 = scmp.ne.s32.totalorder %s237_s11, %s1023_s15  ;;  %p1031_p5 = scmp.lt.s32.totalorder %s237_s11, %s237_s11 }
  0x1a   : > { %p1327_p11 = pnand %p941_p9, %p1555_p1  ;;  %p1032_p7 = scmp.lt.s32.totalorder %s1023_s15, %s1023_s15 }
  0x1c   : > { %p1014_p12 = pneg %p1327_p11  ;;  %p1033_p10 = por %p1032_p7, %p1031_p5 }
  0x1e   : > { %p1026_p0 = pnand %p1024_p13, %p1014_p12 }
  0x20   : > { %p1027_p3 = pneg %p1026_p0 }
  0x22   : > { %p1034_p9 = pnand %p1033_p10, %p1027_p3 }
  0x24   : > { %1037 = shalt.err (!%p1034_p9)
}
  0x25   : > { %s1230_s16 = smov 128   ;;  %s1231_s17 = smov 8  }
  0x26   : > { %s1566_s2 = sld [smem:[#allocation21_spill]]  ;;  %s1049_s20 = scalar_lea.vmem %s250_s14, 512 }
  0x27   : > { %p1050_p1 = scmp.ne.s32.totalorder %s250_s14, %s1049_s20  ;;  %p1057_p2 = scmp.lt.s32.totalorder %s250_s14, %s250_s14 }
  0x28   : > { %p1058_p6 = scmp.lt.s32.totalorder %s1049_s20, %s1049_s20 }
  0x29   : > { %p1052_p13 = pnand %p1050_p1, %p1014_p12 }
  0x2a   : > { %p1059_p5 = por %p1058_p6, %p1057_p2 }
  0x2b   : > { %p1053_p0 = pneg %p1052_p13 }
  0x2c   : > { %944 = dma.hbm_to_vmem [thread:$0]  (!%p1327_p11), %s1566_s2, 512, %s237_s11, [#allocation6], %s1230_s16, %s1230_s16, %s1231_s17  }
  0x2d   : > { %p1060_p10 = pnand %p1059_p5, %p1053_p0 }
  0x2f   : > { %1063 = shalt.err (!%p1060_p10)
}
  0x30   : > { %s1567_s3 = sld [smem:[#allocation22_spill]]  ;;  %s1350_s23 = sadd.s32 1, %s1226_s27  }
  0x31   : > { %s38_s29 = sadd.s32 1, %s1222_s26  ;;  %s35_s10 = ssub.s32 %s1226_s27, %s1350_s23 }
  0x32   : > { %p45_p1 = scmp.ne.s32.totalorder %s1222_s26, %s1218_s25  ;;  %p36_p2 = scmp.eq.s32.totalorder %s35_s10, 0 }
  0x33   : > { %p46_p6 = scmp.eq.s32.totalorder %s1226_s27, 0  ;;  %p1568_p12 = scmp.eq.s32.totalorder %s1299_s28, 1 }
  0x34   : > { %p964_p7 = scmp.lt.s32.totalorder %s1226_s27, 2  ;;  %s1369_s13 = sand.u32 1, %s1222_s26  }
  0x35   : > { %p1360_p3 = por %p1568_p12, %p45_p1  ;;  %p47_p9 = por %p46_p6, %p45_p1 }
  0x36   : > { %947 = dma.hbm_to_vmem [thread:$0]  (!%p1327_p11), %s1567_s3, 512, %s250_s14, [#allocation9], %s1230_s16, %s1230_s16, %s1231_s17  }
  0x37   : > { %s1569_s11 = scalar_select %p1360_p3, 1, 0 }
  0x38   : > { %s1366_s12 = scalar_select %p36_p2, %s1222_s26, %s38_s29  }
  0x39   : > { %s863_s14 = sshll.u32 %s1369_s13, 3  ;;  %s864_s15 = sshll.u32 %s1226_s27, 7 }
  0x3a   : > { %1570 = sst [smem:[#allocation19_spill]] %s1366_s12  ;;  %s273_s19 = scalar_lea.vmem [#allocation2], %s863_s14 }
  0x3b   : > { %s1571_s0 = sld [smem:[#allocation20_spill]]  ;;  %s280_s20 = sshll.u32 %s273_s19, 4  ;;  %s1378_s20 = int_to_ptr.vmem [resolvable:$true] %s280_s20 }
  0x3c   : > { %p1380_p11 = pnand %p964_p7, %p47_p9  ;;  %s270_s29 = scalar_lea.sflag [#allocation3], %s1369_s13 }
  0x3e   : > { %p1066_p0 = pneg %p1380_p11 }
  0x41   : > { %s1376_s18 = scalar_lea.hbm %s1571_s0, %s864_s15  ;;  %s1069_s16 = scalar_lea.hbm %s1571_s0, 256 }
  0x42   : > { %s1064_s10 = scalar_lea.hbm %s1376_s18, 128  ;;  %p1070_p1 = scmp.lt.s32.totalorder %s1376_s18, %s1571_s0 }
  0x43   : > { %p1065_p13 = scmp.ne.s32.totalorder %s1376_s18, %s1064_s10  ;;  %p1071_p2 = scmp.lt.s32.totalorder %s1069_s16, %s1064_s10 }
  0x45   : > { %p1067_p5 = pnand %p1066_p0, %p1065_p13  ;;  %p1072_p6 = por %p1071_p2, %p1070_p1 }
  0x47   : > { %p1068_p10 = pneg %p1067_p5 }
  0x49   : > { %p1073_p12 = pnand %p1072_p6, %p1068_p10 }
  0x4b   : > { %1076 = shalt.err (!%p1073_p12)
}
  0x4c   : > { %s1077_s22 = scalar_lea.vmem %s1378_s20, 128  ;;  %s1232_s14 = smov [#allocation2]  }
  0x4d   : > { %p1078_p7 = scmp.ne.s32.totalorder %s1378_s20, %s1077_s22  ;;  %s1082_s15 = sshll.u32 %s1232_s14, 4  ;;  %s1083_s15 = int_to_ptr.vmem [resolvable:$false] %s1082_s15 }
  0x4e   : > { %s1084_s2 = scalar_lea.vmem %s1083_s15, 256  ;;  %p1085_p5 = scmp.lt.s32.totalorder %s1378_s20, %s1083_s15 }
  0x4f   : > { %p1080_p9 = pnand %p1078_p7, %p1066_p0  ;;  %p1086_p3 = scmp.lt.s32.totalorder %s1084_s2, %s1077_s22 }
  0x51   : > { %p1081_p13 = pneg %p1080_p9  ;;  %p1087_p4 = por %p1086_p3, %p1085_p5 }
  0x53   : > { %p1088_p1 = pnand %p1087_p4, %p1081_p13 }
  0x55   : > { %1091 = shalt.err (!%p1088_p1)
}
  0x56   : > { %951 = dma.hbm_to_vmem [thread:$0]  (!%p1380_p11), %s1376_s18, 128, %s1378_s20, %s270_s29  }
  0x57   : > { %s865_s10 = sshll.u32 %s1226_s27, 4  ;;  %s290_s16 = scalar_lea.vmem [#allocation5], %s1369_s13 }
  0x58   : > { %s297_s17 = sshll.u32 %s290_s16, 4  ;;  %s295_s15 = scalar_lea.hbm %s1548_s1, %s865_s10  ;;  %s298_s17 = int_to_ptr.vmem [resolvable:$true] %s297_s17 }
  0x59   : > { %s1573_s2 = sand.u32 1, %s1226_s27   ;;  %s1092_s0 = scalar_lea.hbm %s295_s15, 16 }
  0x5a   : > { %s288_s22 = scalar_lea.sflag [#allocation6], %s1573_s2  ;;  %p1093_p4 = scmp.ne.s32.totalorder %s295_s15, %s1092_s0 }
  0x5b   : > { %s1097_s18 = scalar_lea.hbm %s1548_s1, 32  ;;  %p1098_p2 = scmp.lt.s32.totalorder %s295_s15, %s1548_s1 }
  0x5c   : > { %p1095_p3 = pnand %p1093_p4, %p1066_p0  ;;  %p1099_p6 = scmp.lt.s32.totalorder %s1097_s18, %s1092_s0 }
  0x5e   : > { %p1096_p10 = pneg %p1095_p3  ;;  %p1100_p12 = por %p1099_p6, %p1098_p2 }
  0x60   : > { %p1101_p7 = pnand %p1100_p12, %p1096_p10 }
  0x62   : > { %1104 = shalt.err (!%p1101_p7)
}
  0x63   : > { %s1105_s29 = scalar_lea.vmem %s298_s17, 16  ;;  %s1233_s10 = smov [#allocation5]  }
  0x64   : > { %p1106_p9 = scmp.ne.s32.totalorder %s298_s17, %s1105_s29  ;;  %s1110_s16 = sshll.u32 %s1233_s10, 4  ;;  %s1111_s16 = int_to_ptr.vmem [resolvable:$false] %s1110_s16 }
  0x65   : > { %s1112_s3 = scalar_lea.vmem %s1111_s16, 32  ;;  %p1113_p1 = scmp.lt.s32.totalorder %s298_s17, %s1111_s16 }
  0x66   : > { %p1108_p13 = pnand %p1106_p9, %p1066_p0  ;;  %p1114_p4 = scmp.lt.s32.totalorder %s1112_s3, %s1105_s29 }
  0x68   : > { %p1109_p5 = pneg %p1108_p13  ;;  %p1115_p3 = por %p1114_p4, %p1113_p1 }
  0x6a   : > { %p1116_p8 = pnand %p1115_p3, %p1109_p5 }
  0x6c   : > { %1119 = shalt.err (!%p1116_p8)
}
  0x6d   : > { %954 = dma.hbm_to_vmem [thread:$0]  (!%p1380_p11), %s295_s15, 16, %s298_s17, %s288_s22  }
  0x6e   : > { %p1574_p10 = scmp.ne.s32.totalorder %s1564_s9, 0 }
  0x6f   : > { %s1434_s0 = sand.u32 (!%p1574_p10), 1, %s1218_s25   ;;  %p1575_p0 = scmp.ne.s32.totalorder (!%p1574_p10), %s1562_s30, 0 }
  0x70   : > { %306 = sbr.rel (%p1574_p10) target bundleno = 1065 (0x429), region = 44  ;;  %s867_s12 = sshll.u32 (!%p1574_p10), %s1434_s0, 3 }
  0x71   : > { %s309_s19 = scalar_lea.sflag (!%p1574_p10), [#allocation3], %s1434_s0  ;;  %s1438_s14 = scalar_lea.vmem (!%p1574_p10), [#allocation2], %s867_s12 }
  0x75   : > { %1189 = dma.done.wait (%p1575_p0), %s309_s19, 128  }
  0x76   : > { %1191 = vsyncadd (%p1575_p0), %s309_s19, 4294967168  ;;  %s317_s9 = sand.u32 1, %s1299_s28   ;;  %s320_s17 = scalar_lea.vmem [#allocation5], %s1434_s0 }
  0x77   : > { %s318_s21 = scalar_lea.sflag [#allocation6], %s317_s9 }
  0x78   : > { %1193 = dma.done.wait (%p1575_p0), %s318_s21, 16  }
  0x79   : > { %1195 = vsyncadd (%p1575_p0), %s318_s21, 4294967280  ;;  %p1576_p8 = scmp.eq.s32.totalorder %s1299_s28, 0 }
  0x7b   : > { %1197 = dma.done.wait (%p1576_p8), [#allocation6], 512   ;;  %p1577_p11 = pmov %p1576_p8 }
  0x7c   : > { %p1578_p2 = pmov %p1576_p8 }
  0x7d   : > { %1199 = vsyncadd (%p1577_p11), [#allocation6], 4294966784 }
  0x7e   : > { %1201 = dma.done.wait (%p1578_p2), [#allocation9], 512   ;;  %p1579_p6 = pmov %p1578_p2 }
  0x7f   : > { %v1234_v0 = vmov 0.0   ;;  %vm1235_vm0 = vmmov 0   ;;  %v375_v1 = vld [vmem:[#allocation8 + $0x18] sm:$0xff]  ;;  %v374_v2 = vld [vmem:[#allocation8 + $0x10] sm:$0xff]  ;;  %v373_v5 = vld [vmem:[#allocation8 + $0x8] sm:$0xff]  ;;  %vm377_vm1 = vcmask 261120   ;;  %v451_v11 = vlaneseq }
  0x80   : > { %1203 = vsyncadd (%p1579_p6), [#allocation9], 4294966784  ;;  %893 = vmatprep.subr.mxu0 %v1234_v0  ;;  %904 = vmatprep.subr.mxu1 %v1234_v0  ;;  %v371_v3 = vld [vmem:[#allocation7 + $0x18] sm:$0xff]  ;;  %v370_v4 = vld [vmem:[#allocation7 + $0x10] sm:$0xff]  ;;  %vm606_vm2 = vcmask 57344   ;;  %vm618_vm3 = vcmask 64512  }
  0x81   : > { %901 = vmatprep.mubr.msk.f32.mxu0 %vm1235_vm0, %v1234_v0  ;;  %912 = vmatprep.mubr.msk.f32.mxu1 %vm1235_vm0, %v1234_v0  ;;  %v369_v6 = vld [vmem:[#allocation7 + $0x8] sm:$0xff]  ;;  %v372_v7 = vld [vmem:[#allocation8] sm:$0xff]  ;;  %v452_v12 = vshrl.u32 %v451_v11, 7  ;;  %s359_s18 = scalar_lea.vmem [#allocation10], %s1434_s0  ;;  %s875_s20 = sshll.u32 %s1299_s28, 4 }
  0x82   : > { %894 = vmatpush3.msra.mxu0 %v375_v1  ;;  %905 = vmatpush3.msra.mxu1 %v371_v3  ;;  %v368_v8 = vld [vmem:[#allocation7] sm:$0xff]  ;;  %v367_v9 = vld [vmem:[%s320_s17] sm:$0x1]  ;;  %s712_s13 = sshll.u32 %s359_s18, 4  ;;  %s710_s16 = scalar_lea.hbm %s1553_s6, %s875_s20  ;;  %s713_s13 = int_to_ptr.vmem [resolvable:$true] %s712_s13 }
  0x83   : > { %895 = vmatprep.subr.mxu0 %v1234_v0  ;;  %906 = vmatprep.subr.mxu1 %v1234_v0  ;;  %v366_v10 = vld [vmem:[%s1438_s14] sm:$0xff]  ;;  %v453_v14 = vsub.s32 0, %v452_v12  ;;  %s696_s3 = scalar_lea.sflag [#allocation4], %s1434_s0  ;;  %s1120_s12 = scalar_lea.vmem %s713_s13, 16 }
  0x84   : > { %896 = vmatpush3.msra.mxu0 %v374_v2  ;;  %907 = vmatpush3.msra.mxu1 %v370_v4  ;;  %v376_v13 = vld [vmem:[%s1551_s4] sm:$0x1]  ;;  %p1121_p12 = scmp.ne.s32.totalorder %s713_s13, %s1120_s12  ;;  %p1580_p7 = scmp.ne.s32.totalorder %s1569_s11, 0 }
  0x85   : > { %897 = vmatprep.subr.mxu0 %v1234_v0  ;;  %908 = vmatprep.subr.mxu1 %v1234_v0  ;;  %v529_v23 = vld [vmem:[%s1552_s5] sm:$0x1]  ;;  %s1236_s19 = smov [#allocation10]  }
  0x86   : > { %898 = vmatpush3.msra.mxu0 %v373_v5  ;;  %909 = vmatpush3.msra.mxu1 %v369_v6  ;;  %p1122_p9 = pnand %p1121_p12, %p1580_p7  ;;  %s1124_s14 = sshll.u32 %s1236_s19, 4  ;;  %s1125_s14 = int_to_ptr.vmem [resolvable:$false] %s1124_s14 }
  0x87   : > { %899 = vmatprep.subr.mxu0 %v1234_v0  ;;  %910 = vmatprep.subr.mxu1 %v1234_v0  ;;  %s1126_s9 = scalar_lea.vmem %s1125_s14, 32  ;;  %p1127_p5 = scmp.lt.s32.totalorder %s713_s13, %s1125_s14 }
  0x88   : > { %900 = vmatpush3.msra.mxu0 %v372_v7  ;;  %911 = vmatpush3.msra.mxu1 %v368_v8  ;;  %p1123_p13 = pneg %p1122_p9  ;;  %p1128_p1 = scmp.lt.s32.totalorder %s1126_s9, %s1120_s12 }
  0x89   : > { %902 = vmatmul.mubr.msk.f32.vlgmr.msra.gmra.mxu0 %vm377_vm1, %v367_v9  ;;  %913 = vmatmul.mubr.msk.f32.vlgmr.msra.gmra.mxu1 %vm377_vm1, %v366_v10 }
  0x8a   : > { %915 = vmatprep.subr.mxu0 %v1234_v0  ;;  %917 = vmatprep.mubr.msk.f32.mxu0 %vm1235_vm0, %v1234_v0  ;;  %p1129_p4 = por %p1128_p1, %p1127_p5 }
  0x8b   : > { %920 = vmatprep.subr.mxu1 %v1234_v0  ;;  %922 = vmatprep.mubr.msk.f32.mxu1 %vm1235_vm0, %v1234_v0 }
  0x8c   : > { %921 = vmatpush3.msra.mxu1 %v366_v10  ;;  %p1130_p3 = pnand %p1129_p4, %p1123_p13 }
 0x149   : > { %v447_v15 = vpop.f32.mrf.mxu0  ;;  %v524_v16 = vpop.f32.mrf.mxu1 }
 0x14a   : > { %v448_v17 = vadd.f32 %v447_v15, %v376_v13 }
 0x14b   : > { %v903_v18 = vpop.f32.mrf.mxu0  ;;  %v914_v19 = vpop.f32.mrf.mxu1 }
 0x14c   : > { %v454_v20 = vrot.slane %v448_v17, %v453_v14 }
 0x14e   : > { %v525_v21 = vadd.f32 %v524_v16, %v454_v20 }
 0x150   : > { %1006 = vtanh.f32 %v525_v21 }
 0x15d   : > { %v1007_v22 = vpop.eup %1006 }
 0x15e   : > { %916 = vmatpush3.xpose.msk.msra.mxu0 %vm377_vm1, %v1007_v22 }
 0x161   : > { %918 = vmatmul.mubr.msk.f32.vlgmr.msra.gmra.mxu0 %vm377_vm1, %v529_v23 }
 0x221   : > { %v602_v24 = vpop.f32.mrf.mxu0 }
 0x222   : > { %v607_v25 = vsel %vm606_vm2, %v602_v24, -inf }
 0x223   : > { %608 = vmax.xlane.f32.xlu0 %v607_v25  ;;  %v919_v26 = vpop.f32.mrf.mxu0 }
 0x2ac   : > { %v609_v27 = vpop.xlane.xlu0 %608 }
 0x2ad   : > { %v610_v28 = vsub.f32 %v602_v24, %v609_v27 }
 0x2af   : > { %v611_v29 = vmul.f32 1.442695, %v610_v28 }
 0x2b1   : > { %1008 = vpow2.f32 %v611_v29 }
 0x2be   : > { %v1009_v30 = vpop.eup %1008 }
 0x2bf   : > { %v613_v31 = vsel %vm606_vm2, %v1009_v30, 0.0 }
 0x2c0   : > { %614 = vadd.xlane.f32.xlu0 %v613_v31 }
 0x349   : > { %v615_v32 = vpop.xlane.xlu0 %614 }
 0x34a   : > { %1010 = vrcp.f32 %v615_v32 }
 0x357   : > { %v1011_v33 = vpop.eup %1010 }
 0x358   : > { %v617_v34 = vmul.f32 %v1011_v33, %v1009_v30 }
 0x35a   : > { %923 = vmatmul.mubr.msk.f32.vlgmr.msra.gmra.mxu1 %vm618_vm3, %v617_v34  ;;  %692 = vst.msk [vmem:[%s359_s18] sm:$0x1] %vm606_vm2, %v617_v34 }
 0x35b   : > { %1133 = shalt.err (!%p1130_p3)
}
 0x35c   : > { %s1134_s21 = scalar_lea.hbm %s710_s16, 16  ;;  %s1138_s15 = scalar_lea.hbm %s1553_s6, 32 }
 0x35d   : > { %p1135_p10 = scmp.ne.s32.totalorder %s710_s16, %s1134_s21  ;;  %p1139_p11 = scmp.lt.s32.totalorder %s710_s16, %s1553_s6 }
 0x35e   : > { %p1140_p2 = scmp.lt.s32.totalorder %s1138_s15, %s1134_s21 }
 0x35f   : > { %p1136_p0 = pnand %p1135_p10, %p1580_p7 }
 0x360   : > { %p1141_p6 = por %p1140_p2, %p1139_p11 }
 0x361   : > { %p1137_p8 = pneg %p1136_p0 }
 0x363   : > { %p1142_p12 = pnand %p1141_p6, %p1137_p8 }
 0x365   : > { %1145 = shalt.err (!%p1142_p12)
}
 0x366   : > { %937 = dma.vmem_to_hbm [thread:$0]  (%p1580_p7), %s713_s13, 16, %s710_s16, %s696_s3   ;;  %vm693_vm4 = vcmask 253952  }
 0x367   : > { %s365_s18 = scalar_lea.vmem [#allocation11], %s1434_s0  ;;  %s1504_s19 = scalar_lea.hbm %s1554_s7, %s875_s20 }
 0x368   : > { %s725_s29 = sshll.u32 %s365_s18, 4  ;;  %s700_s14 = scalar_lea.sflag [#allocation12], %s1434_s0  ;;  %s1506_s29 = int_to_ptr.vmem [resolvable:$true] %s725_s29 }
 0x369   : > { %s1146_s9 = scalar_lea.vmem %s1506_s29, 16  ;;  %s1237_s28 = smov [#allocation11]  }
 0x36a   : > { %p1147_p9 = scmp.ne.s32.totalorder %s1506_s29, %s1146_s9  ;;  %s1150_s13 = sshll.u32 %s1237_s28, 4  ;;  %s1151_s13 = int_to_ptr.vmem [resolvable:$false] %s1150_s13 }
 0x36b   : > { %s1152_s16 = scalar_lea.vmem %s1151_s13, 32  ;;  %p1153_p1 = scmp.lt.s32.totalorder %s1506_s29, %s1151_s13 }
 0x36c   : > { %p1148_p13 = pnand %p1147_p9, %p1580_p7  ;;  %p1154_p4 = scmp.lt.s32.totalorder %s1152_s16, %s1146_s9 }
 0x36e   : > { %p1149_p5 = pneg %p1148_p13  ;;  %p1155_p3 = por %p1154_p4, %p1153_p1 }
 0x370   : > { %p1156_p10 = pnand %p1155_p3, %p1149_p5 }
 0x41a   : > { %v688_v35 = vpop.f32.mrf.mxu1 }
 0x41b   : > { %694 = vst.msk [vmem:[%s365_s18] sm:$0x1] %vm693_vm4, %v688_v35 }
 0x41c   : > { %v924_v36 = vpop.f32.mrf.mxu1 }
 0x41d   : > { %1159 = shalt.err (!%p1156_p10)
}
 0x41e   : > { %s1160_s20 = scalar_lea.hbm %s1504_s19, 16  ;;  %s1164_s21 = scalar_lea.hbm %s1554_s7, 32 }
 0x41f   : > { %p1161_p0 = scmp.ne.s32.totalorder %s1504_s19, %s1160_s20  ;;  %p1165_p2 = scmp.lt.s32.totalorder %s1504_s19, %s1554_s7 }
 0x420   : > { %p1166_p6 = scmp.lt.s32.totalorder %s1164_s21, %s1160_s20 }
 0x421   : > { %p1162_p8 = pnand %p1161_p0, %p1580_p7 }
 0x422   : > { %p1167_p12 = por %p1166_p6, %p1165_p2 }
 0x423   : > { %p1163_p11 = pneg %p1162_p8 }
 0x425   : > { %p1168_p9 = pnand %p1167_p12, %p1163_p11 }
 0x427   : > { %1171 = shalt.err (!%p1168_p9)
}
 0x428   : > { %938 = dma.vmem_to_hbm [thread:$0]  (%p1580_p7), %s1506_s29, 16, %s1504_s19, %s700_s14  }
 0x429 PF: > { %s737_s15 = sand.u32 1, %s1214_s24   ;;  %p1581_p13 = scmp.ne.s32.totalorder %s1563_s8, 0 }
 0x42a   : > { %p1582_p5 = scmp.ge.s32.totalorder %s1226_s27, 2  ;;  %s738_s2 = scalar_lea.sflag [#allocation4], %s737_s15 }
 0x42c   : > { %p956_p1 = pnand %p1582_p5, %p1581_p13 }
 0x42e   : > { %p957_p4 = pneg %p956_p1 }
 0x430   : > { %1205 = dma.done.wait (%p957_p4), %s738_s2, 16  }
 0x431   : > { %1207 = vsyncadd (%p957_p4), %s738_s2, 4294967280  ;;  %s746_s22 = scalar_lea.sflag [#allocation12], %s737_s15 }
 0x432   : > { %1209 = dma.done.wait (%p957_p4), %s746_s22, 16  }
 0x433   : > { %1211 = vsyncadd (%p957_p4), %s746_s22, 4294967280  ;;  %s1583_s11 = sld [smem:[#allocation19_spill]]  ;;  %p28_p7 = scmp.ge.s32.totalorder %s1350_s23, 4  }
 0x434   : > { %s1584_s24 = smov %s1218_s25  ;;  %s1585_s25 = smov %s1222_s26 }
 0x435   : > { %s1587_s27 = smov %s1350_s23  ;;  %30 = sbr.rel (!%p28_p7) target bundleno = 14 (0xe), region = 127 }
 0x439   : > { %s1586_s26 = smov %s1583_s11 }
 0x43a   :  { %750 = vsyncpa [#allocation3], 1 }
 0x43b   :  { %752 = vsyncpa [#allocation3 + $0x1], 1 }
 0x43c   :  { %753 = vsyncpa [#allocation6], 1 }
 0x43d   :  { %755 = vsyncpa [#allocation6 + $0x1], 1 }
 0x43e   :  { %756 = vsyncpa [#allocation9], 1 }
 0x43f   :  { %757 = vsyncpa [#allocation4], 1 }
 0x440   :  { %759 = vsyncpa [#allocation4 + $0x1], 1 }
 0x441   :  { %760 = vsyncpa [#allocation12], 1 }
 0x442   :  { %762 = vsyncpa [#allocation12 + $0x1], 1 }

</bundles_post_ra>
